<compile_context>
chip_gen: v5e
topology: v5e:2x2
jax: 0.10.0
libtpu: 0.0.40
codegen_flags: <defaults>
</compile_context>

<pallas_src>
import functools

import jax
import jax.numpy as jnp
from jax.experimental import pallas as pl
from jax.experimental.pallas import tpu as pltpu


def _round_up(x, m):
    return (x + m - 1) // m * m


def _cdiv(a, b):
    return -(-a // b)


def _mlp_kernel(xt_ref, w1t_ref, b1_ref, w2_ref, b2_ref, out_ref, *, weighted):
    # fc1: (H, 2D) @ (2D, tile) -> (H, tile); bf16 operands, f32 MXU accumulation.
    h = jnp.dot(w1t_ref[...], xt_ref[...], preferred_element_type=jnp.float32)
    h = jnp.maximum(h + b1_ref[...], 0.0)          # bias (H,1) broadcasts over lanes; ReLU
    # fc2: single-output layer stays off the MXU -> VPU mul + sublane reduce.
    s = jnp.sum(h * w2_ref[...], axis=0, keepdims=True) + b2_ref[0]    # (1, tile)
    s = jnp.maximum(s, 0.0) if weighted else jax.nn.sigmoid(s)
    out_ref[...] = s.astype(out_ref.dtype)         # unmasked lane-dense (1, tile) store


@functools.partial(jax.jit, static_argnames=("weighted", "tile_n"))
def link_predictor_mlp(h_u, h_v, w1, b1, w2, b2, *, weighted=False, tile_n=2048):
    """h_u, h_v: (N, D) f32.  w1: (2D, H).  b1: (H,).  w2: (H, 1).  b2: (1,)."""
    n, d = h_u.shape
    two_d = 2 * d
    hdim = w1.shape[1]

    # --- Row-tile selection --------------------------------------------------
    # Cap so there are >= 2 grid steps when n allows (v7x megacore) and so the
    # double-buffered x + out blocks stay well inside every generation's
    # scoped-VMEM budget (v5e 16 MiB default, v7x 64 MiB physical).
    bytes_per_row = two_d * 2 + 4                              # bf16 x column + f32 out
    vmem_tile_cap = max(128, ((8 << 20) // (2 * bytes_per_row)) // 128 * 128)
    cap = min(int(tile_n), max(128, _round_up(_cdiv(n, 2), 128)), vmem_tile_cap)
    cap = max(128, cap // 128 * 128)
    grid = _cdiv(n, cap)
    tile = _round_up(_cdiv(n, grid), 128)                      # padding waste < 128*grid
    n_pad = grid * tile

    # --- Operand packing (fused concat + transpose + bf16 cast, paid once) ----
    x_t = jnp.concatenate([h_u, h_v], axis=-1).T.astype(jnp.bfloat16)   # (2D, N)
    if n_pad != n:
        x_t = jnp.pad(x_t, ((0, 0), (0, n_pad - n)))

    w1t = w1.T.astype(jnp.bfloat16)                            # (H, 2D), resident
    b1c = b1.reshape(hdim, 1).astype(jnp.float32)              # (H, 1) column
    w2c = w2.reshape(hdim, 1).astype(jnp.float32)              # (H, 1) column
    b2r = b2.reshape(1).astype(jnp.float32)                    # scalar, lives in SMEM

    est_vmem = (2 * tile * bytes_per_row                       # x + out, double-buffered
                + two_d * hdim * 2 + hdim * 8) * 2 + (1 << 20)
    vmem_limit = int(min(max(est_vmem, 16 << 20), 32 << 20))

    out = pl.pallas_call(
        functools.partial(_mlp_kernel, weighted=weighted),
        out_shape=jax.ShapeDtypeStruct((1, n_pad), jnp.float32),
        grid_spec=pltpu.PrefetchScalarGridSpec(
            num_scalar_prefetch=0,
            grid=(grid,),
            in_specs=[
                pl.BlockSpec((two_d, tile), lambda i: (0, i)),      # x^T row tile
                pl.BlockSpec((hdim, two_d), lambda i: (0, 0)),      # W1^T (resident)
                pl.BlockSpec((hdim, 1), lambda i: (0, 0)),          # b1 column (resident)
                pl.BlockSpec((hdim, 1), lambda i: (0, 0)),          # w2 column (resident)
                pl.BlockSpec(memory_space=pltpu.MemorySpace.SMEM),  # b2 scalar
            ],
            out_specs=pl.BlockSpec((1, tile), lambda i: (0, i)),
        ),
        compiler_params=pltpu.CompilerParams(
            dimension_semantics=("parallel",),
            vmem_limit_bytes=vmem_limit,
        ),
    )(x_t, w1t, b1c, w2c, b2r)

    # (1, n_pad) lane-dense slab -> (N, 1) column; drop padded rows.
    return out[0, :n].reshape(n, 1)


def _pytorch_like_linear_init(key, fan_in, fan_out):
    """nn.Linear default: U(-1/sqrt(fan_in), 1/sqrt(fan_in)) for W and b."""
    kw, kb = jax.random.split(key)
    bound = 1.0 / jnp.sqrt(fan_in)
    # PyTorch stores W as (out, in); we keep (in, out) for x @ W.
    w = jax.random.uniform(kw, (fan_in, fan_out), jnp.float32, -bound, bound)
    b = jax.random.uniform(kb, (fan_out,), jnp.float32, -bound, bound)
    return w, b


def _reference(h_u, h_v, w1, b1, w2, b2, weighted=False):
    x = jnp.concatenate([h_u, h_v], axis=-1)
    h = jax.nn.relu(x @ w1 + b1)
    s = h @ w2 + b2
    return jax.nn.relu(s) if weighted else jax.nn.sigmoid(s)


if __name__ == "__main__":
    key = jax.random.PRNGKey(0)
    k_hu, k_hv, k_fc1, k_fc2 = jax.random.split(key, 4)

    N = 200            # ragged vs the 128-row tile -> exercises padding + grid=2
    INPUT_DIM = 16     # per-node embedding dim
    HIDDEN_DIM = 64    # module default hidden_dim

    h_u = jax.random.normal(k_hu, (N, INPUT_DIM), jnp.float32)
    h_v = jax.random.normal(k_hv, (N, INPUT_DIM), jnp.float32)

    # fc1: Linear(2*INPUT_DIM, HIDDEN_DIM); fc2: Linear(HIDDEN_DIM, 1)
    w1, b1 = _pytorch_like_linear_init(k_fc1, 2 * INPUT_DIM, HIDDEN_DIM)
    w2, b2 = _pytorch_like_linear_init(k_fc2, HIDDEN_DIM, 1)

    # Sigmoid head (weighted=False, module default).
    out = jax.block_until_ready(link_predictor_mlp(h_u, h_v, w1, b1, w2, b2))
    ref = _reference(h_u, h_v, w1, b1, w2, b2)
    assert out.shape == (N, 1)
    # bf16 inputs/weights inside the kernel -> allow quantization drift vs f32 ref.
    assert jnp.allclose(out, ref, atol=2e-2, rtol=2e-2), "mismatch (sigmoid path)"

    # ReLU head (weighted=True).
    out_w = jax.block_until_ready(
        link_predictor_mlp(h_u, h_v, w1, b1, w2, b2, weighted=True))
    ref_w = _reference(h_u, h_v, w1, b1, w2, b2, weighted=True)
    assert jnp.allclose(out_w, ref_w, atol=2e-2, rtol=2e-2), "mismatch (relu path)"

    print("KERNEL_OK")
</pallas_src>

<mosaic_0001>
module attributes {stable_mosaic.version = 11 : i64} {
  func.func @_mlp_kernel(%arg0: i32, %arg1: memref<32x128xbf16, #tpu.memory_space<vmem>>, %arg2: memref<64x32xbf16, #tpu.memory_space<vmem>>, %arg3: memref<64x1xf32, #tpu.memory_space<vmem>>, %arg4: memref<64x1xf32, #tpu.memory_space<vmem>>, %arg5: memref<1xf32, #tpu.memory_space<smem>>, %arg6: memref<1x128xf32, #tpu.memory_space<vmem>>) attributes {dimension_semantics = [#tpu.dimension_semantics<parallel>], iteration_bounds = array<i64: 2>, scalar_prefetch = 0 : i64, scratch_operands = 0 : i64, tpu.core_type = #tpu.core_type<tc>, window_params = [{transform_indices = @transform_0, window_bounds = array<i64: 32, 128>}, {pipeline_mode = #tpu.pipeline_mode<synchronous>, transform_indices = @transform_1, window_bounds = array<i64: 64, 32>}, {pipeline_mode = #tpu.pipeline_mode<synchronous>, transform_indices = @transform_2, window_bounds = array<i64: 64, 1>}, {pipeline_mode = #tpu.pipeline_mode<synchronous>, transform_indices = @transform_3, window_bounds = array<i64: 64, 1>}, {transform_indices = @transform_4, window_bounds = array<i64: 1>}, {transform_indices = @transform_5, window_bounds = array<i64: 1, 128>}]} {
    %c0 = arith.constant 0 : index
    %c0_0 = arith.constant 0 : index
    %0 = vector.load %arg2[%c0, %c0_0] : memref<64x32xbf16, #tpu.memory_space<vmem>>, vector<64x32xbf16>
    %c0_1 = arith.constant 0 : index
    %c0_2 = arith.constant 0 : index
    %1 = vector.load %arg1[%c0_1, %c0_2] : memref<32x128xbf16, #tpu.memory_space<vmem>>, vector<32x128xbf16>
    %cst = arith.constant dense<0.000000e+00> : vector<64x128xf32>
    %2 = tpu.matmul %0, %1, %cst {dimension_numbers = #tpu.dot_dimension_numbers<[1], [0], [0], [1], [0, 0, 1, 1], [], []>} : vector<64x32xbf16>, vector<32x128xbf16>, vector<64x128xf32> -> vector<64x128xf32>
    %c0_3 = arith.constant 0 : index
    %c0_4 = arith.constant 0 : index
    %3 = vector.load %arg3[%c0_3, %c0_4] : memref<64x1xf32, #tpu.memory_space<vmem>>, vector<64x1xf32>
    %4 = vector.broadcast %3 : vector<64x1xf32> to vector<64x128xf32>
    %5 = arith.addf %2, %4 : vector<64x128xf32>
    %cst_5 = arith.constant 0.000000e+00 : f32
    %6 = vector.broadcast %cst_5 : f32 to vector<64x128xf32>
    %7 = arith.maximumf %5, %6 : vector<64x128xf32>
    %c0_6 = arith.constant 0 : index
    %c0_7 = arith.constant 0 : index
    %8 = vector.load %arg4[%c0_6, %c0_7] : memref<64x1xf32, #tpu.memory_space<vmem>>, vector<64x1xf32>
    %9 = vector.broadcast %8 : vector<64x1xf32> to vector<64x128xf32>
    %10 = arith.mulf %7, %9 : vector<64x128xf32>
    %cst_8 = arith.constant dense<0.000000e+00> : vector<128xf32>
    %11 = vector.multi_reduction <add>, %10, %cst_8 [0] : vector<64x128xf32> to vector<128xf32>
    %12 = vector.shape_cast %11 : vector<128xf32> to vector<1x128xf32>
    %c0_9 = arith.constant 0 : index
    %13 = memref.load %arg5[%c0_9] : memref<1xf32, #tpu.memory_space<smem>>
    %14 = vector.broadcast %13 : f32 to vector<1x128xf32>
    %15 = arith.addf %12, %14 : vector<1x128xf32>
    %16 = arith.negf %15 : vector<1x128xf32>
    %17 = math.exp %16 : vector<1x128xf32>
    %cst_10 = arith.constant 1.000000e+00 : f32
    %18 = vector.broadcast %cst_10 : f32 to vector<1x128xf32>
    %19 = arith.addf %18, %17 : vector<1x128xf32>
    %20 = arith.divf %18, %19 : vector<1x128xf32>
    %c0_11 = arith.constant 0 : index
    %c0_12 = arith.constant 0 : index
    %21 = vector.load %arg6[%c0_11, %c0_12] : memref<1x128xf32, #tpu.memory_space<vmem>>, vector<1x128xf32>
    tpu.vector_store %arg6[%c0_11, %c0_12], %20 {strides = array<i32>} : memref<1x128xf32, #tpu.memory_space<vmem>>, vector<1x128xf32>,
    return
  }
  func.func @transform_0(%arg0: i32) -> (i32, i32) {
    %c0_i32 = arith.constant 0 : i32
    %c0_i32_0 = arith.constant 0 : i32
    return %c0_i32, %arg0 : i32, i32
  }
  func.func @transform_1(%arg0: i32) -> (i32, i32) {
    %c0_i32 = arith.constant 0 : i32
    %c0_i32_0 = arith.constant 0 : i32
    %c0_i32_1 = arith.constant 0 : i32
    return %c0_i32, %c0_i32_0 : i32, i32
  }
  func.func @transform_2(%arg0: i32) -> (i32, i32) {
    %c0_i32 = arith.constant 0 : i32
    %c0_i32_0 = arith.constant 0 : i32
    %c0_i32_1 = arith.constant 0 : i32
    return %c0_i32, %c0_i32_0 : i32, i32
  }
  func.func @transform_3(%arg0: i32) -> (i32, i32) {
    %c0_i32 = arith.constant 0 : i32
    %c0_i32_0 = arith.constant 0 : i32
    %c0_i32_1 = arith.constant 0 : i32
    return %c0_i32, %c0_i32_0 : i32, i32
  }
  func.func @transform_4(%arg0: i32) -> i32 {
    %c0_i32 = arith.constant 0 : i32
    %c0_i32_0 = arith.constant 0 : i32
    return %c0_i32 : i32
  }
  func.func @transform_5(%arg0: i32) -> (i32, i32) {
    %c0_i32 = arith.constant 0 : i32
    %c0_i32_0 = arith.constant 0 : i32
    return %c0_i32, %arg0 : i32, i32
  }
}

</mosaic_0001>

<bundles_post_ra>
// kernel: link_predictor_mlp.1
= control target key start
LH: loop header
LB: loop body
LE: loop exit
PB: predicated region body
PF: predicated region fallthrough
CT: control target
= control target key end

     0   :  { %s820_s0 = inlined_call_operand.vmem [shape: bf16[32,256], index: 0, kind: input, shape index: {}]   ;;  %s821_s1 = inlined_call_operand.vmem [shape: bf16[64,32], index: 1, kind: input, shape index: {}]   ;;  %s822_s2 = inlined_call_operand.vmem [shape: f32[64,1], index: 2, kind: input, shape index: {}]   ;;  %s823_s3 = inlined_call_operand.vmem [shape: f32[64,1], index: 3, kind: input, shape index: {}]   ;;  %s824_s4 = inlined_call_operand.<no memory space> [shape: f32[1], index: 4, kind: input, shape index: {}]   ;;  %s825_s5 = inlined_call_operand.vmem [shape: f32[1,256], index: 5, kind: output, shape index: {}]  }
   0x1   :  { %10 = sst [smem:[#allocation2]] %s824_s4 }
   0x2   :  { %s706_s20 = smov 0   ;;  %s708_s21 = smov 0  }
   0x3   :  { %s710_s22 = smov 0  }
   0x4 LB: > { %s565_s4 = sadd.s32 4294967295, %s670_s22   ;;  %s723_s23 = sadd.s32 1, %s670_s22   ;;  %s670_s22 = sphi %s710_s22, %s828_s22   ;;  %s666_s21 = sphi %s708_s21, %s827_s21   ;;  %s662_s20 = sphi %s706_s20, %s826_s20  }
   0x5   : > { %s20_s24 = ssub.s32 %s670_s22, %s723_s23  ;;  %s23_s25 = sadd.s32 1, %s666_s21 }
   0x6   : > { %p21_p0 = scmp.eq.s32.totalorder %s20_s24, 0  ;;  %p30_p1 = scmp.ne.s32.totalorder %s666_s21, %s662_s20 }
   0x7   : > { %p31_p2 = scmp.eq.s32.totalorder %s670_s22, 0  ;;  %p568_p4 = scmp.ge.s32.totalorder %s670_s22, 2 }
   0x8   : > { %s732_s26 = scalar_select %p21_p0, %s666_s21, %s23_s25  }
   0x9   : > { %p32_p3 = por %p31_p2, %p30_p1  ;;  %178 = sbr.rel (%p568_p4) target bundleno = 22 (0x16), region = 32 }
   0xe   : > { %181 = sbr.rel (!%p32_p3) target bundleno = 22 (0x16), region = 36  ;;  %s183_s27 = sand.u32 (%p32_p3), 1, %s666_s21  }
   0xf   : > { %s570_s28 = sshll.u32 (%p32_p3), %s670_s22, 2  ;;  %s569_s29 = sshll.u32 (%p32_p3), %s183_s27, 4 }
  0x10   : > { %s187_s7 = scalar_lea.vmem (%p32_p3), %s820_s0, %s570_s28  ;;  %s185_s8 = scalar_lea.vmem (%p32_p3), [#allocation3], %s569_s29 }
  0x11   : > { %v204_v0 = vld [vmem:[%s187_s7] sm:$0xf] (%p32_p3)  ;;  %v206_v1 = vld [vmem:[%s187_s7 + $0x8] sm:$0xf] (%p32_p3)  ;;  %v208_v2 = vld [vmem:[%s187_s7 + $0x10] sm:$0xf] (%p32_p3) }
  0x12   : > { %205 = vst [vmem:[%s185_s8] sm:$0xf] (%p32_p3), %v204_v0  ;;  %v210_v3 = vld [vmem:[%s187_s7 + $0x18] sm:$0xf] (%p32_p3) }
  0x13   : > { %207 = vst [vmem:[%s185_s8 + $0x4] sm:$0xf] %v206_v1 }
  0x14   : > { %209 = vst [vmem:[%s185_s8 + $0x8] sm:$0xf] %v208_v2 }
  0x15   : > { %211 = vst [vmem:[%s185_s8 + $0xc] sm:$0xf] %v210_v3 }
  0x16 PF: > { %p571_p5 = scmp.ge.s32.totalorder %s670_s22, 1  ;;  %p242_p6 = scmp.lt.s32.totalorder %s670_s22, 3 }
  0x18   : > { %p243_p7 = pnand %p571_p5, %p242_p6 }
  0x19   : > { %s249_s13 = sand.u32 (!%p243_p7), 1, %s662_s20   ;;  %s489_s10 = sld [smem:[#allocation2]] (!%p243_p7) }
  0x1a   : > { %246 = sbr.rel (%p243_p7) target bundleno = 239 (0xef), region = 77  ;;  %s572_s16 = sshll.u32 (!%p243_p7), %s249_s13, 4 }
  0x1b   : > { %s251_s17 = scalar_lea.vmem (!%p243_p7), [#allocation3], %s572_s16  ;;  %p274_p8 = scmp.lt.s32.totalorder (!%p243_p7), %s565_s4, 1 }
  0x1f   : > { %v292_v4 = vld [vmem:[%s822_s2 + $0x10] sm:$0xff]  ;;  %v290_v5 = vld [vmem:[%s822_s2] sm:$0xff]  ;;  %v672_v6 = vmov 0   ;;  %v609_v8 = vld [vmem:[%s251_s17 + $0x8] sm:$0xff]  ;;  %vm370_vm0 = vcmask 261120   ;;  %s830_s4 = smov (!%p274_p8, %s565_s4), 1 }
  0x20   : > { %642 = vset.pattern.permute.xlu1 %v672_v6  ;;  %641 = vset.pattern.permute.xlu0 %v672_v6  ;;  %v420_v7 = vld [vmem:[%s823_s3] sm:$0xff]  ;;  %v293_v10 = vld [vmem:[%s822_s2 + $0x18] sm:$0xff]  ;;  %v291_v11 = vld [vmem:[%s822_s2 + $0x8] sm:$0xff]  ;;  %s276_s13 = scalar_lea.vmem %s825_s5, %s830_s4 }
  0x21   : > { %310 = vperm.xlu1 %642, %v292_v4   ;;  %300 = vperm.xlu0 %641, %v290_v5   ;;  %v608_v9 = vld [vmem:[%s251_s17] sm:$0xff]  ;;  %v605_v13 = vld [vmem:[%s821_s1 + $0x8] sm:$0xff]  ;;  %v607_v15 = vld [vmem:[%s821_s1 + $0x18] sm:$0xff] }
  0x22   : > { %643 = vset.pattern.permute.xlu2 %v672_v6  ;;  %389 = vmatpush.bf16.msra.mxu0 %v609_v8  ;;  %v604_v12 = vld [vmem:[%s821_s1] sm:$0xff]  ;;  %v606_v14 = vld [vmem:[%s821_s1 + $0x10] sm:$0xff]  ;;  %v421_v16 = vld [vmem:[%s823_s3 + $0x8] sm:$0xff] }
  0x23   : > { %430 = vperm.xlu2 %643, %v420_v7   ;;  %610 = vmatpush.bf16.msra.mxu1 %v609_v8  ;;  %v422_v17 = vld [vmem:[%s823_s3 + $0x10] sm:$0xff]  ;;  %v294_v18 = vld [vmem:[%s822_s2 + $0x20] sm:$0xff]  ;;  %v295_v19 = vld [vmem:[%s822_s2 + $0x28] sm:$0xff] }
  0x24   : > { %611 = vmatpush.bf16.msra.mxu2 %v609_v8  ;;  %612 = vmatpush.bf16.msra.mxu3 %v609_v8  ;;  %v296_v20 = vld [vmem:[%s822_s2 + $0x30] sm:$0xff]  ;;  %v423_v21 = vld [vmem:[%s823_s3 + $0x18] sm:$0xff]  ;;  %v424_v22 = vld [vmem:[%s823_s3 + $0x20] sm:$0xff] }
  0x25   : > { %v425_v23 = vld [vmem:[%s823_s3 + $0x28] sm:$0xff]  ;;  %v297_v24 = vld [vmem:[%s822_s2 + $0x38] sm:$0xff]  ;;  %v426_v25 = vld [vmem:[%s823_s3 + $0x30] sm:$0xff] }
  0x26   : > { %390 = vmatpush.bf16.msra.mxu0 %v608_v9  ;;  %v427_v26 = vld [vmem:[%s823_s3 + $0x38] sm:$0xff] }
  0x27   : > { %613 = vmatpush.bf16.msra.mxu1 %v608_v9 }
  0x28   : > { %614 = vmatpush.bf16.msra.mxu2 %v608_v9  ;;  %615 = vmatpush.bf16.msra.mxu3 %v608_v9 }
  0x29   : > { %315 = vperm.xlu1 %642, %v293_v10   ;;  %305 = vperm.xlu0 %641, %v291_v11  }
  0x2a   : > { %597 = vmatmul.msk.bf16.vlgmr.msra.gmra.mxu0 %vm370_vm0, %v604_v12  ;;  %598 = vmatmul.msk.bf16.vlgmr.msra.gmra.mxu1 %vm370_vm0, %v605_v13 }
  0x2b   : > { %435 = vperm.xlu2 %643, %v421_v16   ;;  %599 = vmatmul.msk.bf16.vlgmr.msra.gmra.mxu2 %vm370_vm0, %v606_v14 }
  0x2c   : > { %600 = vmatmul.msk.bf16.vlgmr.msra.gmra.mxu3 %vm370_vm0, %v607_v15 }
  0x31   : > { %440 = vperm.xlu1 %642, %v422_v17   ;;  %320 = vperm.xlu0 %641, %v294_v18  }
  0x33   : > { %325 = vperm.xlu2 %643, %v295_v19  }
  0x39   : > { %330 = vperm.xlu1 %642, %v296_v20   ;;  %445 = vperm.xlu0 %641, %v423_v21  }
  0x3b   : > { %450 = vperm.xlu2 %643, %v424_v22  }
  0x41   : > { %455 = vperm.xlu1 %642, %v425_v23   ;;  %335 = vperm.xlu0 %641, %v297_v24   ;;  %v490_v23 = vstv %s489_s10 }
  0x43   : > { %460 = vperm.xlu2 %643, %v426_v25  }
  0x49   : > { %465 = vperm.xlu0 %641, %v427_v26  }
  0x7d   : > { %v431_v29 = vpop.permute.xlu2 %430 }
  0x85   : > { %v436_v32 = vpop.permute.xlu2 %435 }
  0x8d   : > { %v326_v37 = vpop.permute.xlu2 %325 }
  0x93   : > { %v301_v27 = vpop.permute.xlu0 %300  ;;  %v311_v28 = vpop.permute.xlu1 %310 }
  0x95   : > { %v451_v52 = vpop.permute.xlu2 %450 }
  0x9b   : > { %v306_v30 = vpop.permute.xlu0 %305  ;;  %v316_v31 = vpop.permute.xlu1 %315 }
  0x9d   : > { %v461_v11 = vpop.permute.xlu2 %460 }
  0xa3   : > { %v321_v33 = vpop.permute.xlu0 %320  ;;  %v441_v36 = vpop.permute.xlu1 %440 }
  0xa7   : > { %v392_v34 = vpop.f32.mrf.mxu0  ;;  %v397_v35 = vpop.f32.mrf.mxu1 }
  0xa8   : > { %v393_v39 = vadd.f32 %v392_v34, %v301_v27  ;;  %v398_v40 = vadd.f32 %v397_v35, %v311_v28 }
  0xaa   : > { %v412_v45 = vmax.f32 %v393_v39, 0.0  ;;  %v414_v49 = vmax.f32 %v398_v40, 0.0 }
  0xab   : > { %v446_v38 = vpop.permute.xlu0 %445  ;;  %v331_v48 = vpop.permute.xlu1 %330 }
  0xac   : > { %v468_v54 = vmul.f32 %v431_v29, %v412_v45  ;;  %v470_v57 = vmul.f32 %v441_v36, %v414_v49 }
  0xae   : > { %v402_v41 = vpop.f32.mrf.mxu2 }
  0xaf   : > { %v407_v42 = vpop.f32.mrf.mxu3  ;;  %v394_v43 = vpop.f32.mrf.mxu0  ;;  %v403_v50 = vadd.f32 %v402_v41, %v321_v33 }
  0xb0   : > { %v399_v44 = vpop.f32.mrf.mxu1  ;;  %v395_v46 = vadd.f32 %v394_v43, %v306_v30  ;;  %v408_v59 = vadd.f32 %v407_v42, %v331_v48 }
  0xb1   : > { %v400_v47 = vadd.f32 %v399_v44, %v316_v31  ;;  %v416_v58 = vmax.f32 %v403_v50, 0.0 }
  0xb2   : > { %v413_v51 = vmax.f32 %v395_v46, 0.0  ;;  %v418_v5 = vmax.f32 %v408_v59, 0.0 }
  0xb3   : > { %v336_v53 = vpop.permute.xlu0 %335  ;;  %v415_v56 = vmax.f32 %v400_v47, 0.0  ;;  %v472_v4 = vmul.f32 %v451_v52, %v416_v58  ;;  %v456_v7 = vpop.permute.xlu1 %455 }
  0xb4   : > { %v469_v55 = vmul.f32 %v436_v32, %v413_v51  ;;  %v474_v13 = vmul.f32 %v461_v11, %v418_v5 }
  0xb5   : > { %v471_v0 = vmul.f32 %v446_v38, %v415_v56 }
  0xb6   : > { %v476_v60 = vadd.f32 %v469_v55, %v468_v54  ;;  %v404_v61 = vpop.f32.mrf.mxu2 }
  0xb7   : > { %v409_v62 = vpop.f32.mrf.mxu3  ;;  %v405_v63 = vadd.f32 %v404_v61, %v326_v37 }
  0xb8   : > { %v477_v1 = vadd.f32 %v476_v60, %v470_v57  ;;  %v410_v2 = vadd.f32 %v409_v62, %v336_v53 }
  0xb9   : > { %v417_v3 = vmax.f32 %v405_v63, 0.0 }
  0xba   : > { %v478_v6 = vadd.f32 %v477_v1, %v471_v0  ;;  %v419_v10 = vmax.f32 %v410_v2, 0.0 }
  0xbb   : > { %v473_v8 = vmul.f32 %v456_v7, %v417_v3  ;;  %v466_v12 = vpop.permute.xlu0 %465 }
  0xbc   : > { %v479_v9 = vadd.f32 %v478_v6, %v472_v4  ;;  %v475_v15 = vmul.f32 %v466_v12, %v419_v10 }
  0xbe   : > { %v480_v14 = vadd.f32 %v479_v9, %v473_v8 }
  0xc0   : > { %v481_v16 = vadd.f32 %v480_v14, %v474_v13 }
  0xc2   : > { %v482_v17 = vadd.f32 %v481_v16, %v475_v15 }
  0xc4   : > { %v483_v18 = vrot.slane %v482_v17, 4 }
  0xc6   : > { %v484_v19 = vadd.f32 %v483_v18, %v482_v17 }
  0xc8   : > { %v485_v20 = vrot.slane %v484_v19, 2 }
  0xca   : > { %v486_v21 = vadd.f32 %v485_v20, %v484_v19 }
  0xcc   : > { %v487_v22 = vrot.slane %v486_v21, 1 }
  0xce   : > { %v488_v24 = vadd.f32 %v487_v22, %v486_v21 }
  0xd0   : > { %v491_v25 = vadd.f32 %v490_v23, %v488_v24 }
  0xd2   : > { %v601_v26 = vmul.f32 -1.442695, %v491_v25 }
  0xd4   : > { %644 = vpow2.f32 %v601_v26 }
  0xda   : > { %v645_v27 = vpop.eup %644 }
  0xdb   : > { %v495_v28 = vadd.f32 1.0, %v645_v27 }
  0xdd   : > { %646 = vrcp.f32 %v495_v28  ;;  %v507_v32 = vand.u32 2147483648, %v495_v28  ;;  %v505_v34 = vand.u32 2147483647, %v495_v28  ;;  %vm501_vm2 = vweird.f32 %v495_v28 }
  0xdf   : > { %v508_v36 = vor.u32 1.1754944e-38, %v507_v32  ;;  %vm506_vm4 = vcmp.eq.f32.partialorder %v505_v34, 8.507059e+37 }
  0xe3   : > { %v647_v29 = vpop.eup %646 }
  0xe4   : > { %v497_v30 = vmul.f32 %v647_v29, %v495_v28  ;;  %vm502_vm1 = vweird.f32 %v647_v29 }
  0xe5   : > { %vm503_vm3 = vmor %vm501_vm2, %vm502_vm1 }
  0xe6   : > { %v498_v31 = vsub.f32 1.0, %v497_v30 }
  0xe8   : > { %v499_v33 = vmul.f32 %v647_v29, %v498_v31 }
  0xea   : > { %v500_v35 = vadd.f32 %v647_v29, %v499_v33 }
  0xec   : > { %v504_v37 = vsel %vm503_vm3, %v647_v29, %v500_v35 }
  0xed   : > { %v509_v38 = vsel %vm506_vm4, %v508_v36, %v504_v37 }
  0xee   : > { %511 = vst [vmem:[%s276_s13] sm:$0x1] %v509_v38 }
  0xef PF: > { %p13_p9 = scmp.ge.s32.totalorder %s723_s23, 4   ;;  %s826_s20 = smov %s666_s21 }
  0xf0   : > { %s827_s21 = smov %s732_s26  ;;  %s828_s22 = smov %s723_s23 }
  0xf1   :  { %15 = sbr.rel (!%p13_p9) target bundleno = 4 (0x4), region = 116 }

</bundles_post_ra>
